<compile_context>
chip_gen: v6e
topology: v6e:2x2x1
jax: 0.10.0
libtpu: 0.0.40
codegen_flags: <defaults>
</compile_context>

<pallas_src>
import jax
import jax.numpy as jnp
from jax.experimental import pallas as pl
from jax.experimental.pallas import tpu as pltpu

_LANE = 128


def _mish_kernel(x_ref, o_ref):
    x = x_ref[...]
    # bf16/f16 inputs compute in f32 (no bf16 EUP on v5e); f32 stays as-is.
    xf = x if x.dtype == jnp.float32 else x.astype(jnp.float32)
    # PyTorch F.softplus uses threshold=20: softplus(x) = x for x > 20, and
    # tanh(x) == 1.0 exactly in f32 there, so y = x on that branch.
    # For x <= 20: tanh(log1p(e^x)) = (t^2 + 2t) / (t^2 + 2t + 2), t = e^x.
    # Clamp the exp argument so the untaken branch never overflows.
    t = jnp.exp(jnp.minimum(xf, 20.0))                    # single EUP transcendental
    u = t * (t + 2.0)
    tanh_sp = jnp.where(xf > 20.0, 1.0, u / (u + 2.0))
    o_ref[...] = (xf * tanh_sp).astype(o_ref.dtype)       # no-op cast for f32 in/out


def _mish_jnp(x):
    """Pure-jnp reference / tiny-tail fallback with torch softplus threshold=20."""
    xf = x.astype(jnp.float32)
    sp = jnp.where(xf > 20.0, xf, jnp.log1p(jnp.exp(jnp.minimum(xf, 20.0))))
    return (xf * jnp.tanh(sp)).astype(x.dtype)


def _sublane_granule(dtype):
    """Packed sublane granule: 8 for 32-bit, 16 for 16-bit, 32 for 8-bit dtypes."""
    itemsize = jnp.dtype(dtype).itemsize
    return max(8, 32 // max(1, itemsize))


def _tpu_config():
    """Returns (target_block_bytes, min_row_blocks) for the local TPU generation."""
    kind = ""
    try:
        kind = jax.devices()[0].device_kind.lower()
    except Exception:
        pass
    if "v7" in kind or "7x" in kind:
        # ~4 MiB tiles; force >=2 grid blocks so both TensorCores get work.
        return 4 * 1024 * 1024, 2
    if "v6" in kind:
        return 4 * 1024 * 1024, 1
    if "v5e" in kind or "v5 lite" in kind or "v5litepod" in kind:
        return 2 * 1024 * 1024, 1
    # Unknown / older generations: conservative 2 MiB tiles.
    return 2 * 1024 * 1024, 1


def _mish_2d(x2d, block_rows):
    """Run the elementwise kernel over a (rows, cols) view, tiling rows only."""
    rows, cols = x2d.shape
    dtype = x2d.dtype
    itemsize = jnp.dtype(dtype).itemsize
    n = rows * cols
    # VMEM footprint of one tile including (sublane, lane) layout padding.
    tile_vmem = (pl.cdiv(block_rows, 8) * 8) * (pl.cdiv(cols, _LANE) * _LANE) * itemsize
    # 2 in-buffers + 2 out-buffers (default double buffering) + headroom.
    vmem_limit = int(max(4 * tile_vmem + (2 << 20), 8 << 20))
    return pl.pallas_call(
        _mish_kernel,
        out_shape=jax.ShapeDtypeStruct((rows, cols), dtype),
        grid=(pl.cdiv(rows, block_rows),),
        in_specs=[pl.BlockSpec((block_rows, cols), lambda i: (i, 0))],
        out_specs=pl.BlockSpec((block_rows, cols), lambda i: (i, 0)),
        compiler_params=pltpu.CompilerParams(
            dimension_semantics=("parallel",),   # lets v7x split rows over 2 TCs
            vmem_limit_bytes=vmem_limit,
        ),
        cost_estimate=pl.CostEstimate(
            flops=7 * n,
            transcendentals=2 * n,
            bytes_accessed=2 * n * itemsize,
        ),
    )(x2d)


def mish(x: jnp.ndarray) -> jnp.ndarray:
    """Elementwise Mish matching torch semantics (shape & dtype preserved)."""
    orig_shape = x.shape
    dtype = x.dtype
    n = x.size
    if n == 0:
        return x
    itemsize = jnp.dtype(dtype).itemsize
    granule = _sublane_granule(dtype)
    target_block_bytes, min_row_blocks = _tpu_config()

    # ---------- fast path: element count divisible by 128 ----------
    cols = None
    for c in (32768, 16384, 8192, 4096, 2048, 1024, 512, 256, 128):
        if n % c == 0:
            cols = c
            break

    if cols is not None:
        rows = n // cols
        x2d = jnp.reshape(x, (rows, cols))          # free: contiguous reshape, no pad
        br = max(granule, target_block_bytes // (cols * itemsize))
        # v7x: guarantee >= min_row_blocks grid steps for >1 MiB tensors.
        if (min_row_blocks > 1 and n * itemsize > (1 << 20)
                and rows >= min_row_blocks * granule):
            br = min(br, rows // min_row_blocks)
        if br >= rows:
            br = rows                               # single block spans all rows
        else:
            br = max(granule, (br // granule) * granule)
            if rows % br:
                # Prefer a br that divides rows (unmasked last block), but only
                # shrink the tile by at most 2x.
                lo = max(granule, ((br // 2) // granule) * granule)
                cand = br - granule
                while cand >= lo:
                    if rows % cand == 0:
                        br = cand
                        break
                    cand -= granule
        out2d = _mish_2d(x2d, br)
        return jnp.reshape(out2d, orig_shape)

    # ---------- ragged path: n % 128 != 0 (rare) ----------
    # Free reshape to (rows, last_dim); tile rows only, full ragged trailing
    # dim per block.  Exactly 1 HBM read + 1 write (no pad / slice round trips).
    last = x.shape[-1] if x.ndim >= 1 else 1
    rows = n // last
    per_row_vmem = pl.cdiv(last, _LANE) * _LANE * itemsize
    br = max(granule, target_block_bytes // per_row_vmem)
    if br >= rows:
        br = rows
    else:
        br = max(granule, (br // granule) * granule)
    tile_vmem = (pl.cdiv(br, 8) * 8) * pl.cdiv(last, _LANE) * _LANE * itemsize
    if tile_vmem <= (8 << 20):
        out2d = _mish_2d(jnp.reshape(x, (rows, last)), br)
        return jnp.reshape(out2d, orig_shape)

    # Last resort (pathological: ragged total size AND a huge ragged trailing
    # dim): Pallas over the largest 128-divisible prefix, tiny (<128 elem)
    # tail in plain jnp.
    flat = jnp.reshape(x, (-1,))
    n_main = (n // _LANE) * _LANE
    tail = _mish_jnp(flat[n_main:])
    if n_main == 0:
        return jnp.reshape(tail, orig_shape)
    head = mish(flat[:n_main])                      # recurses into the fast path
    return jnp.reshape(jnp.concatenate([head, tail]), orig_shape)


if __name__ == "__main__":
    key = jax.random.PRNGKey(0)

    # Primary: NCHW conv-activation-like input (fast, no-pad path).
    x = jax.random.normal(key, (2, 4, 16, 16), dtype=jnp.float32) * 3.0
    # Exercise both softplus branches explicitly.
    x = x.at[0, 0, 0, 0].set(25.0)
    x = x.at[0, 0, 0, 1].set(-30.0)
    y = mish(x)
    jax.block_until_ready(y)
    assert y.shape == x.shape and y.dtype == x.dtype
    assert jnp.allclose(y, _mish_jnp(x), atol=1e-5, rtol=1e-5)

    # bf16 input (16-row sublane granule path; f32 internal math).
    xb = (jax.random.normal(jax.random.PRNGKey(2), (2, 4, 16, 16)) * 3.0).astype(jnp.bfloat16)
    yb = mish(xb)
    jax.block_until_ready(yb)
    assert yb.dtype == jnp.bfloat16
    assert jnp.allclose(yb.astype(jnp.float32), _mish_jnp(xb).astype(jnp.float32),
                        atol=2e-2, rtol=2e-2)

    # ~3 MiB tensor: exercises the multi-block grid (and >=2 blocks on v7x).
    xm = jax.random.normal(jax.random.PRNGKey(3), (2, 96, 64, 64), dtype=jnp.float32) * 3.0
    ym = mish(xm)
    jax.block_until_ready(ym)
    assert jnp.allclose(ym, _mish_jnp(xm), atol=1e-5, rtol=1e-5)

    # Non-128-divisible element count: exercises the ragged 1R+1W path.
    x2 = jax.random.normal(jax.random.PRNGKey(1), (3, 5, 7, 7), dtype=jnp.float32) * 3.0
    y2 = mish(x2)
    jax.block_until_ready(y2)
    assert y2.shape == x2.shape and y2.dtype == x2.dtype
    assert jnp.allclose(y2, _mish_jnp(x2), atol=1e-5, rtol=1e-5)

    print("KERNEL_OK")
</pallas_src>

<mosaic_0001>
module attributes {stable_mosaic.version = 11 : i64} {
  func.func @_mish_kernel(%arg0: i32, %arg1: memref<1x2048xf32, #tpu.memory_space<vmem>>, %arg2: memref<1x2048xf32, #tpu.memory_space<vmem>>) attributes {dimension_semantics = [#tpu.dimension_semantics<parallel>], iteration_bounds = array<i64: 1>, scalar_prefetch = 0 : i64, scratch_operands = 0 : i64, tpu.core_type = #tpu.core_type<tc>, window_params = [{transform_indices = @transform_0, window_bounds = array<i64: 1, 2048>}, {transform_indices = @transform_1, window_bounds = array<i64: 1, 2048>}]} {
    %c0 = arith.constant 0 : index
    %c0_0 = arith.constant 0 : index
    %0 = vector.load %arg1[%c0, %c0_0] : memref<1x2048xf32, #tpu.memory_space<vmem>>, vector<1x2048xf32>
    %cst = arith.constant 2.000000e+01 : f32
    %1 = vector.broadcast %cst : f32 to vector<1x2048xf32>
    %2 = arith.minimumf %0, %1 : vector<1x2048xf32>
    %3 = math.exp %2 : vector<1x2048xf32>
    %cst_1 = arith.constant 2.000000e+00 : f32
    %4 = vector.broadcast %cst_1 : f32 to vector<1x2048xf32>
    %5 = arith.addf %3, %4 : vector<1x2048xf32>
    %6 = arith.mulf %3, %5 : vector<1x2048xf32>
    %cst_2 = arith.constant 2.000000e+01 : f32
    %7 = vector.broadcast %cst_2 : f32 to vector<1x2048xf32>
    %8 = arith.cmpf ogt, %0, %7 : vector<1x2048xf32>
    %cst_3 = arith.constant 2.000000e+00 : f32
    %9 = vector.broadcast %cst_3 : f32 to vector<1x2048xf32>
    %10 = arith.addf %6, %9 : vector<1x2048xf32>
    %11 = arith.divf %6, %10 : vector<1x2048xf32>
    %cst_4 = arith.constant 1.000000e+00 : f32
    %12 = vector.broadcast %cst_4 : f32 to vector<1x2048xf32>
    %13 = arith.select %8, %12, %11 : vector<1x2048xi1>, vector<1x2048xf32>
    %14 = arith.mulf %0, %13 : vector<1x2048xf32>
    %c0_5 = arith.constant 0 : index
    %c0_6 = arith.constant 0 : index
    %15 = vector.load %arg2[%c0_5, %c0_6] : memref<1x2048xf32, #tpu.memory_space<vmem>>, vector<1x2048xf32>
    tpu.vector_store %arg2[%c0_5, %c0_6], %14 {strides = array<i32>} : memref<1x2048xf32, #tpu.memory_space<vmem>>, vector<1x2048xf32>,
    return
  }
  func.func @transform_0(%arg0: i32) -> (i32, i32) {
    %c0_i32 = arith.constant 0 : i32
    %c0_i32_0 = arith.constant 0 : i32
    return %arg0, %c0_i32 : i32, i32
  }
  func.func @transform_1(%arg0: i32) -> (i32, i32) {
    %c0_i32 = arith.constant 0 : i32
    %c0_i32_0 = arith.constant 0 : i32
    return %arg0, %c0_i32 : i32, i32
  }
}

</mosaic_0001>

<bundles_post_ra>
// kernel: tpu_custom_call.1
= control target key start
LH: loop header
LB: loop body
LE: loop exit
PB: predicated region body
PF: predicated region fallthrough
CT: control target
= control target key end

     0   :  { %6 = vsyncpa [#allocation3], 0  ;;  %s134_s0 = inlined_call_operand.hbm [shape: f32[1,2048], index: 0, kind: input, shape index: {}]   ;;  %s135_s1 = inlined_call_operand.hbm [shape: f32[1,2048], index: 1, kind: output, shape index: {}]  }
   0x1   :  { %7 = vsyncpa [#allocation4], 0  ;;  %s116_s6 = smov [#allocation2]  }
   0x2   :  { %s14_s7 = sshll.u32 %s116_s6, 4  ;;  %s15_s7 = int_to_ptr.vmem [resolvable:$true] %s14_s7 }
   0x3   :  { %s80_s8 = scalar_lea.vmem %s15_s7, 256  ;;  %p85_p1 = scmp.lt.s32.totalorder %s15_s7, %s15_s7 }
   0x4   :  { %p81_p0 = scmp.ne.s32.totalorder %s15_s7, %s80_s8  ;;  %p86_p2 = scmp.lt.s32.totalorder %s80_s8, %s80_s8 }
   0x6   :  { %p87_p3 = por %p86_p2, %p85_p1 }
   0x8   :  { %p88_p4 = pnand %p87_p3, %p81_p0 }
   0xa   :  { %91 = shalt.err (!%p88_p4)
}
   0xb   :  { %17 = dma.hbm_to_vmem [thread:$0]  %s134_s0, 256, %s15_s7, [#allocation3]  }
   0xc   :  { %112 = dma.done.wait [#allocation3], 256  }
   0xd   :  { %113 = vsyncadd [#allocation3], 4294967040  ;;  %v21_v0 = vld [vmem:[#allocation2] sm:$0xff]  ;;  %v22_v1 = vld [vmem:[#allocation2 + $0x8] sm:$0xff]  ;;  %s117_s0 = smov [#allocation5]  }
   0xe   :  { %v23_v2 = vmin.f32 %v21_v0, 20.0  ;;  %v24_v3 = vmin.f32 %v22_v1, 20.0  ;;  %vm33_vm0 = vcmp.gt.f32.partialorder %v21_v0, 20.0  ;;  %vm34_vm1 = vcmp.gt.f32.partialorder %v22_v1, 20.0  ;;  %s53_s11 = sshll.u32 %s117_s0, 4  ;;  %s54_s11 = int_to_ptr.vmem [resolvable:$true] %s53_s11 }
   0xf   :  { %s92_s12 = scalar_lea.vmem %s54_s11, 256  ;;  %p97_p6 = scmp.lt.s32.totalorder %s54_s11, %s54_s11 }
  0x10   :  { %v25_v4 = vmul.f32 1.442695, %v23_v2  ;;  %v27_v5 = vmul.f32 1.442695, %v24_v3  ;;  %p93_p5 = scmp.ne.s32.totalorder %s54_s11, %s92_s12  ;;  %p98_p7 = scmp.lt.s32.totalorder %s92_s12, %s92_s12 }
  0x12   :  { %64 = vpow2.f32 %v25_v4  ;;  %p99_p8 = por %p98_p7, %p97_p6 }
  0x13   :  { %66 = vpow2.f32 %v27_v5 }
  0x14   :  { %p100_p9 = pnand %p99_p8, %p93_p5 }
  0x1f   :  { %v65_v6 = vpop.eup %64 }
  0x20   :  { %v67_v7 = vpop.eup %66  ;;  %v29_v8 = vadd.f32 2.0, %v65_v6 }
  0x21   :  { %v30_v9 = vadd.f32 2.0, %v67_v7 }
  0x22   :  { %v31_v10 = vmul.f32 %v65_v6, %v29_v8 }
  0x23   :  { %v32_v11 = vmul.f32 %v67_v7, %v30_v9 }
  0x24   :  { %v35_v12 = vadd.f32 2.0, %v31_v10 }
  0x25   :  { %v36_v13 = vadd.f32 2.0, %v32_v11 }
  0x26   :  { %68 = vrcp.f32 %v35_v12 }
  0x27   :  { %70 = vrcp.f32 %v36_v13 }
  0x33   :  { %v69_v14 = vpop.eup %68 }
  0x34   :  { %v71_v15 = vpop.eup %70  ;;  %v38_v16 = vmul.f32 %v69_v14, %v31_v10 }
  0x35   :  { %v40_v17 = vmul.f32 %v71_v15, %v32_v11 }
  0x36   :  { %v41_v18 = vsel %vm33_vm0, 1.0, %v38_v16 }
  0x37   :  { %v43_v19 = vmul.f32 %v41_v18, %v21_v0  ;;  %v42_v20 = vsel %vm34_vm1, 1.0, %v40_v17 }
  0x38   :  { %v44_v21 = vmul.f32 %v42_v20, %v22_v1 }
  0x39   :  { %45 = vst [vmem:[#allocation5] sm:$0xff] %v43_v19 }
  0x3a   :  { %46 = vst [vmem:[#allocation5 + $0x8] sm:$0xff] %v44_v21 }
  0x3b   :  { %103 = shalt.err (!%p100_p9)
}
  0x3c   :  { %56 = dma.vmem_to_hbm [thread:$0]  %s54_s11, 256, %s135_s1, [#allocation4]  }
  0x3d   :  { %114 = dma.done.wait [#allocation4], 256  }
  0x3e   :  { %115 = vsyncadd [#allocation4], 4294967040 }
  0x3f   :  { %60 = vsyncpa [#allocation3], 1 }
  0x40   :  { %61 = vsyncpa [#allocation4], 1 }

</bundles_post_ra>
